<compile_context>
chip_gen: v7x
topology: tpu7x:2x2x1
jax: 0.10.0
libtpu: 0.0.40
codegen_flags: <defaults>
</compile_context>

<pallas_src>
import jax
import jax.numpy as jnp
from jax.experimental import pallas as pl
from jax.experimental.pallas import tpu as pltpu


# ----------------------------- kernels ------------------------------------ #


def _make_fused_kernel(num_modalities: int, attention_dim: int):
    """v6e/v7x path: one (H, A+F) matmul per modality (W = [w1 | wf])."""
    M, A = num_modalities, attention_dim

    def kernel(*refs):
        x_refs = refs[:M]                                # M x (TB, H)  in-dtype
        w_ref, b1_ref, w2_ref, b2_ref, bf_ref = refs[M:M + 5]
        out_ref = refs[M + 5]                            # (TB, F)  out-dtype

        w = w_ref[...]                                   # (H, A+F) bf16
        b1 = b1_ref[...]                                 # (1, A)   f32
        w2 = w2_ref[...]                                 # (1, A)   f32
        b2 = b2_ref[0, 0]                                # scalar   f32 (SMEM)
        bf = bf_ref[...]                                 # (1, F)   f32

        scores = []                                      # M x (TB, 1) f32
        y_fused = []                                     # M x (TB, F) f32
        for m in range(M):
            xm = x_refs[m][...].astype(jnp.bfloat16)                     # (TB, H)
            y = jnp.dot(xm, w, preferred_element_type=jnp.float32)       # (TB, A+F)
            h = jnp.tanh(y[:, :A] + b1)                                  # (TB, A)
            scores.append(jnp.sum(h * w2, axis=-1, keepdims=True) + b2)  # (TB, 1)
            y_fused.append(y[:, A:])                                     # (TB, F)

        # Softmax over modalities on the M (TB,1) columns (no (TB,M) array).
        m_max = scores[0]
        for m in range(1, M):
            m_max = jnp.maximum(m_max, scores[m])
        es = [jnp.exp(s - m_max) for s in scores]
        denom = es[0]
        for m in range(1, M):
            denom = denom + es[m]
        inv = pl.reciprocal(denom)                       # exact (EUP slot)

        # fused = sum_m attn_m * (x_m @ wf) + bf  ==  (sum_m attn_m * x_m) @ wf + bf
        acc = bf + (es[0] * inv) * y_fused[0]
        for m in range(1, M):
            acc = acc + (es[m] * inv) * y_fused[m]       # (TB, F) f32

        out_ref[...] = jnp.maximum(acc, 0.0).astype(out_ref.dtype)

    return kernel


def _make_split_kernel(num_modalities: int):
    """v5e path (128-wide MXU): separate attention and fusion matmuls."""
    M = num_modalities

    def kernel(*refs):
        x_refs = refs[:M]                                # M x (TB, H)  in-dtype
        w1_ref, b1_ref, w2_ref, b2_ref, wf_ref, bf_ref = refs[M:M + 6]
        out_ref = refs[M + 6]                            # (TB, F)  out-dtype

        w1 = w1_ref[...]                                 # (H, A) bf16
        b1 = b1_ref[...]                                 # (1, A) f32
        w2 = w2_ref[...]                                 # (1, A) f32
        b2 = b2_ref[0, 0]                                # scalar f32 (SMEM)
        wf = wf_ref[...]                                 # (H, F) bf16
        bf = bf_ref[...]                                 # (1, F) f32

        scores = []
        for m in range(M):
            xm = x_refs[m][...].astype(jnp.bfloat16)
            h = jnp.tanh(jnp.dot(xm, w1, preferred_element_type=jnp.float32) + b1)
            scores.append(jnp.sum(h * w2, axis=-1, keepdims=True) + b2)   # (TB, 1)

        m_max = scores[0]
        for m in range(1, M):
            m_max = jnp.maximum(m_max, scores[m])
        es = [jnp.exp(s - m_max) for s in scores]
        denom = es[0]
        for m in range(1, M):
            denom = denom + es[m]
        inv = pl.reciprocal(denom)                       # exact (EUP slot)

        ctx = (es[0] * inv) * x_refs[0][...].astype(jnp.float32)
        for m in range(1, M):
            ctx = ctx + (es[m] * inv) * x_refs[m][...].astype(jnp.float32)

        fused = jnp.dot(ctx.astype(jnp.bfloat16), wf,
                        preferred_element_type=jnp.float32) + bf          # (TB, F)
        out_ref[...] = jnp.maximum(fused, 0.0).astype(out_ref.dtype)

    return kernel


# --------------------------- wrapper helpers ------------------------------- #


def _vmem_capacity_bytes() -> int:
    try:
        return int(pltpu.get_tpu_info().vmem_capacity_bytes)
    except Exception:
        return 64 * 1024 * 1024          # conservative (v7x-sized) fallback


def _default_fuse_weights(attention_dim: int, fused_dim: int) -> bool:
    # Fuse [w1 | wf] only when it rides the 256-wide MXU for free (v6e/v7x).
    if attention_dim + fused_dim > 256:
        return False
    try:
        info = pltpu.get_tpu_info()
        name = str(getattr(info, "chip_version", getattr(info, "version", ""))).lower()
        if "v5" in name:
            return False                 # 128-wide MXU: keep two-matmul form
    except Exception:
        pass
    return True


def _derive_block_b(B, H, M, A, F, in_bytes, out_bytes, requested):
    """Largest batch tile whose double-buffered streams + f32 temps fit VMEM."""
    budget = int(_vmem_capacity_bytes() * 0.55)
    per_row = 2 * (M * H * in_bytes + F * out_bytes)          # dbl-buffered I/O
    per_row += 4 * (M * (A + F) + H + F)                      # f32 intermediates
    tb = max(8, budget // max(per_row, 1))
    tb = min(tb, requested)
    if tb >= B:
        return B
    return max(8, (tb // 8) * 8)


# ------------------------------- entry ------------------------------------- #


def attention_fusion(embeddings_list, params, *, block_b: int = 1024,
                     out_dtype=None, fuse_weights=None):
    """embeddings_list: list of M (B, H) arrays (f32 or bf16).

    Returns (B, 128) in `out_dtype` (defaults to the embedding dtype).
    """
    M = len(embeddings_list)
    B, H = embeddings_list[0].shape
    w1, b1, w2, b2, wf, bf = params
    A = w1.shape[1]
    Fdim = wf.shape[1]

    in_dtype = embeddings_list[0].dtype
    if out_dtype is None:
        out_dtype = in_dtype
    if fuse_weights is None:
        fuse_weights = _default_fuse_weights(A, Fdim)

    in_bytes = jnp.dtype(in_dtype).itemsize
    out_bytes = jnp.dtype(out_dtype).itemsize

    # Biases / small params in f32; scalar b2 rides SMEM.
    b1_row = b1.reshape(1, A).astype(jnp.float32)
    w2_row = w2.reshape(1, A).astype(jnp.float32)
    b2_s = b2.reshape(1, 1).astype(jnp.float32)
    bf_row = bf.reshape(1, Fdim).astype(jnp.float32)

    # Batch tile: generation-aware, multiple of 8 (partial last block is fine:
    # rows are independent and OOB output rows are masked on writeback).
    TB = _derive_block_b(B, H, M, A, Fdim, in_bytes, out_bytes, block_b)
    grid = (pl.cdiv(B, TB),)

    x_spec = pl.BlockSpec((TB, H), lambda i: (i, 0))
    const = lambda shape: pl.BlockSpec(shape, lambda i: (0, 0))   # VMEM-resident
    smem_spec = pl.BlockSpec(memory_space=pltpu.MemorySpace.SMEM)
    out_spec = pl.BlockSpec((TB, Fdim), lambda i: (i, 0))

    weight_bytes = H * (A + Fdim) * 2 + (3 * A + Fdim + 1) * 4
    if fuse_weights:
        w_cat = jnp.concatenate([w1, wf], axis=1).astype(jnp.bfloat16)  # (H, A+F)
        kernel = _make_fused_kernel(M, A)
        in_specs = [x_spec] * M + [const((H, A + Fdim)), const((1, A)),
                                   const((1, A)), smem_spec, const((1, Fdim))]
        operands = (*embeddings_list, w_cat, b1_row, w2_row, b2_s, bf_row)
        flops = 2 * M * B * H * (A + Fdim)
    else:
        w1_bf = w1.astype(jnp.bfloat16)
        wf_bf = wf.astype(jnp.bfloat16)
        kernel = _make_split_kernel(M)
        in_specs = [x_spec] * M + [const((H, A)), const((1, A)), const((1, A)),
                                   smem_spec, const((H, Fdim)), const((1, Fdim))]
        operands = (*embeddings_list, w1_bf, b1_row, w2_row, b2_s, wf_bf, bf_row)
        flops = 2 * M * B * H * A + 2 * B * H * Fdim

    cost = pl.CostEstimate(
        flops=int(flops),
        transcendentals=int(M * B * A + M * B + B),      # tanh + exp + recip
        bytes_accessed=int(M * B * H * in_bytes + B * Fdim * out_bytes
                           + weight_bytes),
    )

    vmem_limit = max(32 * 1024 * 1024,
                     min(int(_vmem_capacity_bytes() * 0.75), 100 * 1024 * 1024))

    return pl.pallas_call(
        kernel,
        out_shape=jax.ShapeDtypeStruct((B, Fdim), out_dtype),
        grid=grid,
        in_specs=in_specs,
        out_specs=out_spec,
        compiler_params=pltpu.CompilerParams(
            dimension_semantics=("parallel",),   # shard batch across TCs (v7x)
            vmem_limit_bytes=vmem_limit,
        ),
        cost_estimate=cost,
    )(*operands)


# --------------------------- init & reference ------------------------------ #


def init_params(key, hidden_dim, attention_dim=128, fused_dim=128):
    """PyTorch-Linear-style init: U(-1/sqrt(fan_in), 1/sqrt(fan_in)); W stored (in, out)."""
    ks = jax.random.split(key, 6)

    def lin(kw, kb, fan_in, fan_out):
        bound = 1.0 / jnp.sqrt(fan_in)
        w = jax.random.uniform(kw, (fan_in, fan_out), jnp.float32, -bound, bound)
        b = jax.random.uniform(kb, (1, fan_out), jnp.float32, -bound, bound)
        return w, b

    w1, b1 = lin(ks[0], ks[1], hidden_dim, attention_dim)     # Linear(H, A)
    w2, b2 = lin(ks[2], ks[3], attention_dim, 1)              # Linear(A, 1)
    wf, bf = lin(ks[4], ks[5], hidden_dim, fused_dim)         # Linear(H, 128)
    return (w1, b1, w2, b2, wf, bf)


def attention_fusion_ref(embeddings_list, params):
    """Plain-JAX f32 reference mirroring the PyTorch forward (eval mode)."""
    w1, b1, w2, b2, wf, bf = params
    x = jnp.stack(embeddings_list, axis=1).astype(jnp.float32)   # (B, M, H)
    h = jnp.tanh(x @ w1 + b1[None, :, :])                        # (B, M, A)
    scores = h @ w2 + b2[None, :, :]                             # (B, M, 1)
    attn = jax.nn.softmax(scores, axis=1)
    ctx = jnp.sum(x * attn, axis=1)                              # (B, H)
    return jnp.maximum(ctx @ wf + bf, 0.0)                       # (B, 128)


# --------------------------------- main ------------------------------------ #


if __name__ == "__main__":
    B, M, H = 16, 3, 32          # batch, num modalities, hidden_dim
    ATTN_DIM, FUSED_DIM = 128, 128

    key = jax.random.PRNGKey(0)
    k_params, *k_emb = jax.random.split(key, 1 + M)

    params = init_params(k_params, H, ATTN_DIM, FUSED_DIM)
    emb_f32 = [jax.random.normal(k, (B, H), jnp.float32) for k in k_emb]
    ref = attention_fusion_ref(emb_f32, params)

    # 1) f32 embeddings, fused [w1|wf] path (v6e/v7x); block_b=8 exercises grid=(2,).
    out_fused = jax.block_until_ready(
        attention_fusion(emb_f32, params, block_b=8, fuse_weights=True,
                         out_dtype=jnp.float32))
    assert out_fused.shape == (B, FUSED_DIM)
    assert jnp.allclose(out_fused, ref, rtol=2e-2, atol=2e-2), (
        "fused-path mismatch: max abs diff = "
        f"{float(jnp.max(jnp.abs(out_fused - ref)))}")

    # 2) f32 embeddings, split two-matmul path (v5e form).
    out_split = jax.block_until_ready(
        attention_fusion(emb_f32, params, block_b=8, fuse_weights=False,
                         out_dtype=jnp.float32))
    assert jnp.allclose(out_split, ref, rtol=2e-2, atol=2e-2), (
        "split-path mismatch: max abs diff = "
        f"{float(jnp.max(jnp.abs(out_split - ref)))}")

    # 3) bf16 embeddings in, bf16 out (the bandwidth-optimal path).
    emb_bf16 = [e.astype(jnp.bfloat16) for e in emb_f32]
    out_bf16 = jax.block_until_ready(attention_fusion(emb_bf16, params, block_b=8))
    assert out_bf16.dtype == jnp.bfloat16
    assert jnp.allclose(out_bf16.astype(jnp.float32), ref, rtol=1e-1, atol=1e-1), (
        "bf16-path mismatch: max abs diff = "
        f"{float(jnp.max(jnp.abs(out_bf16.astype(jnp.float32) - ref)))}")

    # TODO(synk): train-mode Dropout(0.5) (stateful RNG masking) not implemented;
    # eval-mode identity is used, matching PyTorch inference semantics.
    print("KERNEL_OK")
</pallas_src>

<mosaic_0001>
module attributes {stable_mosaic.version = 11 : i64} {
  func.func @kernel(%arg0: i32, %arg1: memref<8x32xf32, #tpu.memory_space<vmem>>, %arg2: memref<8x32xf32, #tpu.memory_space<vmem>>, %arg3: memref<8x32xf32, #tpu.memory_space<vmem>>, %arg4: memref<32x256xbf16, #tpu.memory_space<vmem>>, %arg5: memref<1x128xf32, #tpu.memory_space<vmem>>, %arg6: memref<1x128xf32, #tpu.memory_space<vmem>>, %arg7: memref<1x1xf32, #tpu.memory_space<smem>>, %arg8: memref<1x128xf32, #tpu.memory_space<vmem>>, %arg9: memref<8x128xf32, #tpu.memory_space<vmem>>) attributes {dimension_semantics = [#tpu.dimension_semantics<parallel>], iteration_bounds = array<i64: 2>, scalar_prefetch = 0 : i64, scratch_operands = 0 : i64, tpu.core_type = #tpu.core_type<tc>, window_params = [{transform_indices = @transform_0, window_bounds = array<i64: 8, 32>}, {transform_indices = @transform_1, window_bounds = array<i64: 8, 32>}, {transform_indices = @transform_2, window_bounds = array<i64: 8, 32>}, {pipeline_mode = #tpu.pipeline_mode<synchronous>, transform_indices = @transform_3, window_bounds = array<i64: 32, 256>}, {pipeline_mode = #tpu.pipeline_mode<synchronous>, transform_indices = @transform_4, window_bounds = array<i64: 1, 128>}, {pipeline_mode = #tpu.pipeline_mode<synchronous>, transform_indices = @transform_5, window_bounds = array<i64: 1, 128>}, {transform_indices = @transform_6, window_bounds = array<i64: 1, 1>}, {pipeline_mode = #tpu.pipeline_mode<synchronous>, transform_indices = @transform_7, window_bounds = array<i64: 1, 128>}, {transform_indices = @transform_8, window_bounds = array<i64: 8, 128>}]} {
    %c0 = arith.constant 0 : index
    %c0_0 = arith.constant 0 : index
    %0 = vector.load %arg4[%c0, %c0_0] : memref<32x256xbf16, #tpu.memory_space<vmem>>, vector<32x256xbf16>
    %c0_1 = arith.constant 0 : index
    %c0_2 = arith.constant 0 : index
    %1 = vector.load %arg5[%c0_1, %c0_2] : memref<1x128xf32, #tpu.memory_space<vmem>>, vector<1x128xf32>
    %c0_3 = arith.constant 0 : index
    %c0_4 = arith.constant 0 : index
    %2 = vector.load %arg6[%c0_3, %c0_4] : memref<1x128xf32, #tpu.memory_space<vmem>>, vector<1x128xf32>
    %c0_5 = arith.constant 0 : index
    %c0_6 = arith.constant 0 : index
    %3 = memref.load %arg7[%c0_5, %c0_6] : memref<1x1xf32, #tpu.memory_space<smem>>
    %c0_7 = arith.constant 0 : index
    %c0_8 = arith.constant 0 : index
    %4 = vector.load %arg8[%c0_7, %c0_8] : memref<1x128xf32, #tpu.memory_space<vmem>>, vector<1x128xf32>
    %c0_9 = arith.constant 0 : index
    %c0_10 = arith.constant 0 : index
    %5 = vector.load %arg1[%c0_9, %c0_10] : memref<8x32xf32, #tpu.memory_space<vmem>>, vector<8x32xf32>
    %6 = arith.truncf %5 : vector<8x32xf32> to vector<8x32xbf16>
    %cst = arith.constant dense<0.000000e+00> : vector<8x256xf32>
    %7 = tpu.matmul %6, %0, %cst {dimension_numbers = #tpu.dot_dimension_numbers<[1], [0], [0], [1], [0, 0, 1, 1], [], []>} : vector<8x32xbf16>, vector<32x256xbf16>, vector<8x256xf32> -> vector<8x256xf32>
    %8 = vector.extract_strided_slice %7 {offsets = [0, 0], sizes = [8, 128], strides = [1, 1]} : vector<8x256xf32> to vector<8x128xf32>
    %9 = vector.broadcast %1 : vector<1x128xf32> to vector<8x128xf32>
    %10 = arith.addf %8, %9 : vector<8x128xf32>
    %11 = math.tanh %10 : vector<8x128xf32>
    %12 = vector.broadcast %2 : vector<1x128xf32> to vector<8x128xf32>
    %13 = arith.mulf %11, %12 : vector<8x128xf32>
    %cst_11 = arith.constant dense<0.000000e+00> : vector<8xf32>
    %14 = vector.multi_reduction <add>, %13, %cst_11 [1] : vector<8x128xf32> to vector<8xf32>
    %15 = vector.shape_cast %14 : vector<8xf32> to vector<8x1xf32>
    %16 = vector.broadcast %3 : f32 to vector<8x1xf32>
    %17 = arith.addf %15, %16 : vector<8x1xf32>
    %18 = vector.extract_strided_slice %7 {offsets = [0, 128], sizes = [8, 128], strides = [1, 1]} : vector<8x256xf32> to vector<8x128xf32>
    %c0_12 = arith.constant 0 : index
    %c0_13 = arith.constant 0 : index
    %19 = vector.load %arg2[%c0_12, %c0_13] : memref<8x32xf32, #tpu.memory_space<vmem>>, vector<8x32xf32>
    %20 = arith.truncf %19 : vector<8x32xf32> to vector<8x32xbf16>
    %cst_14 = arith.constant dense<0.000000e+00> : vector<8x256xf32>
    %21 = tpu.matmul %20, %0, %cst_14 {dimension_numbers = #tpu.dot_dimension_numbers<[1], [0], [0], [1], [0, 0, 1, 1], [], []>} : vector<8x32xbf16>, vector<32x256xbf16>, vector<8x256xf32> -> vector<8x256xf32>
    %22 = vector.extract_strided_slice %21 {offsets = [0, 0], sizes = [8, 128], strides = [1, 1]} : vector<8x256xf32> to vector<8x128xf32>
    %23 = vector.broadcast %1 : vector<1x128xf32> to vector<8x128xf32>
    %24 = arith.addf %22, %23 : vector<8x128xf32>
    %25 = math.tanh %24 : vector<8x128xf32>
    %26 = vector.broadcast %2 : vector<1x128xf32> to vector<8x128xf32>
    %27 = arith.mulf %25, %26 : vector<8x128xf32>
    %cst_15 = arith.constant dense<0.000000e+00> : vector<8xf32>
    %28 = vector.multi_reduction <add>, %27, %cst_15 [1] : vector<8x128xf32> to vector<8xf32>
    %29 = vector.shape_cast %28 : vector<8xf32> to vector<8x1xf32>
    %30 = vector.broadcast %3 : f32 to vector<8x1xf32>
    %31 = arith.addf %29, %30 : vector<8x1xf32>
    %32 = vector.extract_strided_slice %21 {offsets = [0, 128], sizes = [8, 128], strides = [1, 1]} : vector<8x256xf32> to vector<8x128xf32>
    %c0_16 = arith.constant 0 : index
    %c0_17 = arith.constant 0 : index
    %33 = vector.load %arg3[%c0_16, %c0_17] : memref<8x32xf32, #tpu.memory_space<vmem>>, vector<8x32xf32>
    %34 = arith.truncf %33 : vector<8x32xf32> to vector<8x32xbf16>
    %cst_18 = arith.constant dense<0.000000e+00> : vector<8x256xf32>
    %35 = tpu.matmul %34, %0, %cst_18 {dimension_numbers = #tpu.dot_dimension_numbers<[1], [0], [0], [1], [0, 0, 1, 1], [], []>} : vector<8x32xbf16>, vector<32x256xbf16>, vector<8x256xf32> -> vector<8x256xf32>
    %36 = vector.extract_strided_slice %35 {offsets = [0, 0], sizes = [8, 128], strides = [1, 1]} : vector<8x256xf32> to vector<8x128xf32>
    %37 = vector.broadcast %1 : vector<1x128xf32> to vector<8x128xf32>
    %38 = arith.addf %36, %37 : vector<8x128xf32>
    %39 = math.tanh %38 : vector<8x128xf32>
    %40 = vector.broadcast %2 : vector<1x128xf32> to vector<8x128xf32>
    %41 = arith.mulf %39, %40 : vector<8x128xf32>
    %cst_19 = arith.constant dense<0.000000e+00> : vector<8xf32>
    %42 = vector.multi_reduction <add>, %41, %cst_19 [1] : vector<8x128xf32> to vector<8xf32>
    %43 = vector.shape_cast %42 : vector<8xf32> to vector<8x1xf32>
    %44 = vector.broadcast %3 : f32 to vector<8x1xf32>
    %45 = arith.addf %43, %44 : vector<8x1xf32>
    %46 = vector.extract_strided_slice %35 {offsets = [0, 128], sizes = [8, 128], strides = [1, 1]} : vector<8x256xf32> to vector<8x128xf32>
    %47 = arith.maximumf %17, %31 : vector<8x1xf32>
    %48 = arith.maximumf %47, %45 : vector<8x1xf32>
    %49 = arith.subf %17, %48 : vector<8x1xf32>
    %50 = math.exp %49 : vector<8x1xf32>
    %51 = arith.subf %31, %48 : vector<8x1xf32>
    %52 = math.exp %51 : vector<8x1xf32>
    %53 = arith.subf %45, %48 : vector<8x1xf32>
    %54 = math.exp %53 : vector<8x1xf32>
    %55 = arith.addf %50, %52 : vector<8x1xf32>
    %56 = arith.addf %55, %54 : vector<8x1xf32>
    %57 = tpu.reciprocal %56 : vector<8x1xf32> -> vector<8x1xf32>
    %58 = arith.mulf %50, %57 : vector<8x1xf32>
    %59 = vector.broadcast %58 : vector<8x1xf32> to vector<8x128xf32>
    %60 = arith.mulf %59, %18 : vector<8x128xf32>
    %61 = vector.broadcast %4 : vector<1x128xf32> to vector<8x128xf32>
    %62 = arith.addf %61, %60 : vector<8x128xf32>
    %63 = arith.mulf %52, %57 : vector<8x1xf32>
    %64 = vector.broadcast %63 : vector<8x1xf32> to vector<8x128xf32>
    %65 = arith.mulf %64, %32 : vector<8x128xf32>
    %66 = arith.addf %62, %65 : vector<8x128xf32>
    %67 = arith.mulf %54, %57 : vector<8x1xf32>
    %68 = vector.broadcast %67 : vector<8x1xf32> to vector<8x128xf32>
    %69 = arith.mulf %68, %46 : vector<8x128xf32>
    %70 = arith.addf %66, %69 : vector<8x128xf32>
    %cst_20 = arith.constant 0.000000e+00 : f32
    %71 = vector.broadcast %cst_20 : f32 to vector<8x128xf32>
    %72 = arith.maximumf %70, %71 : vector<8x128xf32>
    %c0_21 = arith.constant 0 : index
    %c0_22 = arith.constant 0 : index
    %73 = vector.load %arg9[%c0_21, %c0_22] : memref<8x128xf32, #tpu.memory_space<vmem>>, vector<8x128xf32>
    tpu.vector_store %arg9[%c0_21, %c0_22], %72 {strides = array<i32>} : memref<8x128xf32, #tpu.memory_space<vmem>>, vector<8x128xf32>,
    return
  }
  func.func @transform_0(%arg0: i32) -> (i32, i32) {
    %c0_i32 = arith.constant 0 : i32
    %c0_i32_0 = arith.constant 0 : i32
    return %arg0, %c0_i32 : i32, i32
  }
  func.func @transform_1(%arg0: i32) -> (i32, i32) {
    %c0_i32 = arith.constant 0 : i32
    %c0_i32_0 = arith.constant 0 : i32
    return %arg0, %c0_i32 : i32, i32
  }
  func.func @transform_2(%arg0: i32) -> (i32, i32) {
    %c0_i32 = arith.constant 0 : i32
    %c0_i32_0 = arith.constant 0 : i32
    return %arg0, %c0_i32 : i32, i32
  }
  func.func @transform_3(%arg0: i32) -> (i32, i32) {
    %c0_i32 = arith.constant 0 : i32
    %c0_i32_0 = arith.constant 0 : i32
    %c0_i32_1 = arith.constant 0 : i32
    return %c0_i32, %c0_i32_0 : i32, i32
  }
  func.func @transform_4(%arg0: i32) -> (i32, i32) {
    %c0_i32 = arith.constant 0 : i32
    %c0_i32_0 = arith.constant 0 : i32
    %c0_i32_1 = arith.constant 0 : i32
    return %c0_i32, %c0_i32_0 : i32, i32
  }
  func.func @transform_5(%arg0: i32) -> (i32, i32) {
    %c0_i32 = arith.constant 0 : i32
    %c0_i32_0 = arith.constant 0 : i32
    %c0_i32_1 = arith.constant 0 : i32
    return %c0_i32, %c0_i32_0 : i32, i32
  }
  func.func @transform_6(%arg0: i32) -> (i32, i32) {
    %c0_i32 = arith.constant 0 : i32
    %c0_i32_0 = arith.constant 0 : i32
    %c0_i32_1 = arith.constant 0 : i32
    return %c0_i32, %c0_i32_0 : i32, i32
  }
  func.func @transform_7(%arg0: i32) -> (i32, i32) {
    %c0_i32 = arith.constant 0 : i32
    %c0_i32_0 = arith.constant 0 : i32
    %c0_i32_1 = arith.constant 0 : i32
    return %c0_i32, %c0_i32_0 : i32, i32
  }
  func.func @transform_8(%arg0: i32) -> (i32, i32) {
    %c0_i32 = arith.constant 0 : i32
    %c0_i32_0 = arith.constant 0 : i32
    return %arg0, %c0_i32 : i32, i32
  }
}

</mosaic_0001>

<bundles_post_ra>
// kernel: tpu_custom_call.1
= control target key start
LH: loop header
LB: loop body
LE: loop exit
PB: predicated region body
PF: predicated region fallthrough
CT: control target
= control target key end

     0   :  { %s1436_s0 = inlined_call_operand.hbm [shape: f32[16,32], index: 0, kind: input, shape index: {}]   ;;  %s1437_s1 = inlined_call_operand.hbm [shape: f32[16,32], index: 1, kind: input, shape index: {}]   ;;  %s1438_s2 = inlined_call_operand.hbm [shape: f32[16,32], index: 2, kind: input, shape index: {}]   ;;  %s1439_s3 = inlined_call_operand.hbm [shape: bf16[32,256], index: 3, kind: input, shape index: {}]   ;;  %s1440_s4 = inlined_call_operand.vmem [shape: f32[1,128], index: 4, kind: input, shape index: {}]   ;;  %s1441_s5 = inlined_call_operand.vmem [shape: f32[1,128], index: 5, kind: input, shape index: {}]   ;;  %s1442_s6 = inlined_call_operand.<no memory space> [shape: f32[1,1], index: 6, kind: input, shape index: {}]   ;;  %s1443_s7 = inlined_call_operand.vmem [shape: f32[1,128], index: 7, kind: input, shape index: {}]   ;;  %s1444_s8 = inlined_call_operand.hbm [shape: f32[16,128], index: 8, kind: output, shape index: {}]  }
   0x1   :  { %1463 = sst [smem:[#allocation22_spill]] %s1437_s1 }
   0x2   :  { %1464 = sst [smem:[#allocation23_spill]] %s1443_s7 }
   0x3   :  { %1465 = sst [smem:[#allocation24_spill]] %s1444_s8 }
   0x4   :  { %13 = sst [smem:[#allocation2]] %s1442_s6 }
   0x5   :  { %14 = vsyncpa [#allocation4], 0 }
   0x6   :  { %16 = vsyncpa [#allocation4 + $0x1], 0 }
   0x7   :  { %17 = vsyncpa [#allocation7], 0 }
   0x8   :  { %19 = vsyncpa [#allocation7 + $0x1], 0 }
   0x9   :  { %20 = vsyncpa [#allocation10], 0 }
   0xa   :  { %21 = vsyncpa [#allocation5], 0 }
   0xb   :  { %23 = vsyncpa [#allocation5 + $0x1], 0  ;;  %s1145_s29 = smov 0   ;;  %s1147_s30 = smov 0  }
   0xc   :  { %s1149_s9 = smov 0   ;;  %s1151_s10 = smov 0  }
   0xd LB: > { %1466 = sst [smem:[#allocation16_spill]] %s1075_s29  ;;  %s1166_s6 = sadd.s32 1, %s1087_s10   ;;  %s1087_s10 = sphi %s1151_s10, %s1498_s10   ;;  %s1083_s9 = sphi %s1149_s9, %s1502_s9   ;;  %s1079_s30 = sphi %s1147_s30, %s1501_s30   ;;  %s1075_s29 = sphi %s1145_s29, %s1500_s29  }
   0xe   : > { %1467 = sst [smem:[#allocation17_spill]] %s1087_s10  ;;  %s36_s11 = sadd.s32 1, %s1083_s9 }
   0xf   : > { %1468 = sst [smem:[#allocation18_spill]] %s1166_s6  ;;  %s33_s12 = ssub.s32 %s1087_s10, %s1166_s6 }
  0x10   : > { %p1445_p0 = scmp.ne.s32.totalorder %s1083_s9, %s1079_s30  ;;  %p34_p1 = scmp.eq.s32.totalorder %s33_s12, 0 }
  0x11   : > { %p44_p2 = scmp.eq.s32.totalorder %s1087_s10, 0  ;;  %p836_p4 = scmp.lt.s32.totalorder %s1087_s10, 2 }
  0x12   : > { %s1177_s13 = scalar_select %p34_p1, %s1083_s9, %s36_s11  }
  0x13   : > { %p45_p5 = por %p44_p2, %p1445_p0  ;;  %s1446_s14 = sand.u32 1, %s1083_s9  }
  0x14   : > { %1469 = sst [smem:[#allocation19_spill]] %s1177_s13  ;;  %s1185_s15 = sshll.u32 %s1446_s14, 3 }
  0x15   : > { %s1188_s16 = sshll.u32 %s1087_s10, 7  ;;  %p1190_p6 = pnand %p836_p4, %p45_p5 }
  0x16   : > { %s299_s18 = sand.u32 1, %s1087_s10   ;;  %s1471_s1 = sld [smem:[#allocation22_spill]] }
  0x17   : > { %s1470_s17 = scalar_select %p1190_p6, 1, 0 }
  0x18   : > { %s303_s22 = scalar_lea.vmem [#allocation6], %s1185_s15  ;;  %s1204_s24 = scalar_lea.sflag [#allocation7], %s299_s18 }
  0x19   : > { %s310_s23 = sshll.u32 %s303_s22, 4  ;;  %p1210_p8 = pneg %p1190_p6  ;;  %s1202_s23 = int_to_ptr.vmem [resolvable:$true] %s310_s23 }
  0x1b   : > { %s1472_s26 = scalar_select %p1210_p8, 1, 0 }
  0x1c   : > { %s1199_s21 = scalar_lea.hbm %s1471_s1, %s1188_s16  ;;  %s900_s11 = scalar_lea.hbm %s1471_s1, 256 }
  0x1d   : > { %s895_s25 = scalar_lea.hbm %s1199_s21, 128  ;;  %p901_p11 = scmp.lt.u32.totalorder %s1199_s21, %s1471_s1 }
  0x1e   : > { %p896_p7 = scmp.ne.s32.totalorder %s1199_s21, %s895_s25  ;;  %p902_p12 = scmp.lt.u32.totalorder %s900_s11, %s895_s25 }
  0x1f   : > { %p904_p1 = scmp.lt.u32.totalorder %s895_s25, %s1199_s21 }
  0x20   : > { %p898_p9 = pnand %p1210_p8, %p896_p7  ;;  %p903_p13 = por %p902_p12, %p901_p11 }
  0x22   : > { %p899_p10 = pneg %p898_p9  ;;  %p905_p2 = por %p904_p1, %p903_p13 }
  0x24   : > { %p906_p4 = pnand %p905_p2, %p899_p10 }
  0x26   : > { %909 = shalt.err (!%p906_p4)
}
  0x27   : > { %s910_s18 = scalar_lea.vmem %s1202_s23, 128  ;;  %s1089_s20 = smov [#allocation6]  }
  0x28   : > { %p911_p5 = scmp.ne.s32.totalorder %s1202_s23, %s910_s18  ;;  %s915_s22 = sshll.u32 %s1089_s20, 4  ;;  %s916_s22 = int_to_ptr.vmem [resolvable:$false] %s915_s22 }
  0x29   : > { %s917_s27 = scalar_lea.vmem %s916_s22, 256  ;;  %p918_p3 = scmp.lt.s32.totalorder %s1202_s23, %s916_s22 }
  0x2a   : > { %p913_p7 = pnand %p911_p5, %p1210_p8  ;;  %p919_p0 = scmp.lt.s32.totalorder %s917_s27, %s910_s18 }
  0x2c   : > { %p914_p9 = pneg %p913_p7  ;;  %p920_p11 = por %p919_p0, %p918_p3 }
  0x2e   : > { %p921_p12 = pnand %p920_p11, %p914_p9 }
  0x30   : > { %924 = shalt.err (!%p921_p12)
}
  0x31   : > { %827 = dma.hbm_to_vmem [thread:$0]  (!%p1190_p6), %s1199_s21, 128, %s1202_s23, %s1204_s24  }
  0x32   : > { %s1235_s25 = sadd.s32 4294967295, %s1087_s10   ;;  %s775_s28 = sadd.s32 4294967294, %s1087_s10  }
  0x33   : > { %p49_p0 = scmp.ne.s32.totalorder %s1079_s30, %s1075_s29  ;;  %p1453_p3 = scmp.eq.s32.totalorder %s1235_s25, 0 }
  0x34   : > { %p230_p10 = scmp.eq.s32.totalorder %s1235_s25, 1  ;;  %p236_p13 = scmp.eq.s32.totalorder %s775_s28, 1 }
  0x35   : > { %p1244_p1 = por %p1453_p3, %p49_p0  ;;  %p776_p2 = scmp.ge.s32.totalorder %s1087_s10, 1 }
  0x36   : > { %p1474_p4 = scmp.ne.s32.totalorder %s1083_s9, %s1079_s30  ;;  %p1256_p7 = por %p236_p13, %p49_p0 }
  0x37   : > { %s1473_s11 = scalar_select %p1244_p1, 1, 0 }
  0x38   : > { %p1252_p5 = por %p230_p10, %p1474_p4  ;;  %p243_p9 = scmp.lt.s32.totalorder %s1087_s10, 3 }
  0x39   : > { %s1477_s23 = scalar_select %p1256_p7, 1, 0 }
  0x3a   : > { %s1475_s21 = scalar_select %p1252_p5, 1, 0 }
  0x3b   : > { %1478 = sst [smem:[#allocation21_spill]] %s1477_s23  ;;  %p1261_p11 = pnand %p776_p2, %p243_p9 }
  0x3c   : > { %1476 = sst [smem:[#allocation20_spill]] %s1475_s21  ;;  %s1090_s19 = smov [#allocation9]  }
  0x3d   : > { %s1479_s12 = scalar_select %p1261_p11, 1, 0 }
  0x3e   : > { %s255_s18 = sshll.u32 %s1090_s19, 4  ;;  %p817_p12 = pneg %p1261_p11  ;;  %s1265_s18 = int_to_ptr.vmem [resolvable:$true] %s255_s18 }
  0x3f   : > { %s1273_s27 = scalar_lea.hbm %s1436_s0, %s1188_s16  ;;  %s285_s14 = scalar_lea.vmem [#allocation3], %s1185_s15 }
  0x40   : > { %p1277_p0 = pnand %p817_p12, %p1453_p3  ;;  %s292_s1 = sshll.u32 %s285_s14, 4  ;;  %s1282_s1 = int_to_ptr.vmem [resolvable:$true] %s292_s1 }
  0x41   : > { %s1288_s6 = scalar_lea.hbm %s1438_s2, %s1188_s16  ;;  %s925_s20 = scalar_lea.hbm %s1439_s3, 512 }
  0x42   : > { %p926_p10 = scmp.ne.s32.totalorder %s1439_s3, %s925_s20  ;;  %p927_p13 = pneg %p1277_p0 }
  0x43   : > { %p932_p9 = scmp.lt.u32.totalorder %s925_s20, %s1439_s3 }
  0x44   : > { %p928_p2 = pnand %p927_p13, %p926_p10 }
  0x46   : > { %p929_p4 = pneg %p928_p2 }
  0x48   : > { %p934_p12 = pnand %p932_p9, %p929_p4 }
  0x4a   : > { %937 = shalt.err (!%p934_p12)
}
  0x4b   : > { %s938_s13 = scalar_lea.vmem %s1265_s18, 512  ;;  %p946_p1 = scmp.lt.s32.totalorder %s1265_s18, %s1265_s18 }
  0x4c   : > { %p939_p3 = scmp.ne.s32.totalorder %s1265_s18, %s938_s13  ;;  %p947_p11 = scmp.lt.s32.totalorder %s938_s13, %s938_s13 }
  0x4e   : > { %p941_p7 = pnand %p939_p3, %p927_p13  ;;  %p948_p6 = por %p947_p11, %p946_p1 }
  0x50   : > { %p942_p5 = pneg %p941_p7 }
  0x52   : > { %p949_p8 = pnand %p948_p6, %p942_p5 }
  0x54   : > { %952 = shalt.err (!%p949_p8)
}
  0x55   : > { %s1091_s29 = smov 128   ;;  %s1092_s8 = smov 8  }
  0x56   : > { %820 = dma.hbm_to_vmem [thread:$0]  (!%p1277_p0), %s1439_s3, 512, %s1265_s18, [#allocation10], %s1091_s29, %s1091_s29, %s1092_s8  }
  0x57   : > { %s1481_s23 = sand.u32 1, %s1083_s9   ;;  %s953_s20 = scalar_lea.hbm %s1273_s27, 128 }
  0x58   : > { %s282_s19 = scalar_lea.sflag [#allocation4], %s1481_s23  ;;  %p954_p6 = scmp.ne.s32.totalorder %s1273_s27, %s953_s20 }
  0x59   : > { %p1482_p8 = scmp.ne.s32.totalorder %s1472_s26, 0  ;;  %s958_s13 = scalar_lea.hbm %s1436_s0, 256 }
  0x5a   : > { %p959_p5 = scmp.lt.u32.totalorder %s1273_s27, %s1436_s0  ;;  %p960_p7 = scmp.lt.u32.totalorder %s958_s13, %s953_s20 }
  0x5b   : > { %p956_p3 = pnand %p954_p6, %p1482_p8  ;;  %p962_p10 = scmp.lt.u32.totalorder %s953_s20, %s1273_s27 }
  0x5c   : > { %p961_p11 = por %p960_p7, %p959_p5 }
  0x5d   : > { %p957_p1 = pneg %p956_p3 }
  0x5e   : > { %p963_p13 = por %p962_p10, %p961_p11 }
  0x60   : > { %p964_p0 = pnand %p963_p13, %p957_p1 }
  0x62   : > { %967 = shalt.err (!%p964_p0)
}
  0x63   : > { %s968_s18 = scalar_lea.vmem %s1282_s1, 128  ;;  %s1093_s28 = smov [#allocation3]  }
  0x64   : > { %p969_p2 = scmp.ne.s32.totalorder %s1282_s1, %s968_s18  ;;  %s973_s29 = sshll.u32 %s1093_s28, 4  ;;  %s974_s29 = int_to_ptr.vmem [resolvable:$false] %s973_s29 }
  0x65   : > { %s975_s7 = scalar_lea.vmem %s974_s29, 256  ;;  %p976_p12 = scmp.lt.s32.totalorder %s1282_s1, %s974_s29 }
  0x66   : > { %p971_p4 = pnand %p969_p2, %p1482_p8  ;;  %p977_p6 = scmp.lt.s32.totalorder %s975_s7, %s968_s18 }
  0x68   : > { %p972_p9 = pneg %p971_p4  ;;  %p978_p3 = por %p977_p6, %p976_p12 }
  0x6a   : > { %p979_p5 = pnand %p978_p3, %p972_p9 }
  0x6c   : > { %982 = shalt.err (!%p979_p5)
}
  0x6d   : > { %p1483_p1 = scmp.ne.s32.totalorder %s1470_s17, 0  ;;  %s321_s21 = scalar_lea.vmem [#allocation8], %s1185_s15 }
  0x6e   : > { %s328_s8 = sshll.u32 %s321_s21, 4  ;;  %s983_s10 = scalar_lea.hbm %s1288_s6, 128  ;;  %s329_s8 = int_to_ptr.vmem [resolvable:$true] %s328_s8 }
  0x6f   : > { %824 = dma.hbm_to_vmem [thread:$0]  (!%p1483_p1), %s1273_s27, 128, %s1282_s1, %s282_s19  }
  0x70   : > { %p984_p7 = scmp.ne.s32.totalorder %s1288_s6, %s983_s10  ;;  %s988_s20 = scalar_lea.hbm %s1438_s2, 256 }
  0x71   : > { %p989_p13 = scmp.lt.u32.totalorder %s1288_s6, %s1438_s2  ;;  %p990_p0 = scmp.lt.u32.totalorder %s988_s20, %s983_s10 }
  0x72   : > { %p986_p11 = pnand %p984_p7, %p1482_p8  ;;  %p992_p4 = scmp.lt.u32.totalorder %s983_s10, %s1288_s6 }
  0x73   : > { %p991_p2 = por %p990_p0, %p989_p13 }
  0x74   : > { %p987_p10 = pneg %p986_p11 }
  0x75   : > { %p993_p9 = por %p992_p4, %p991_p2 }
  0x77   : > { %p994_p12 = pnand %p993_p9, %p987_p10 }
  0x79   : > { %997 = shalt.err (!%p994_p12)
}
  0x7a   : > { %s998_s1 = scalar_lea.vmem %s329_s8, 128  ;;  %s1094_s15 = smov [#allocation8]  }
  0x7b   : > { %p999_p6 = scmp.ne.s32.totalorder %s329_s8, %s998_s1  ;;  %s1003_s27 = sshll.u32 %s1094_s15, 4  ;;  %s1004_s27 = int_to_ptr.vmem [resolvable:$false] %s1003_s27 }
  0x7c   : > { %s1005_s19 = scalar_lea.vmem %s1004_s27, 256  ;;  %p1006_p7 = scmp.lt.s32.totalorder %s329_s8, %s1004_s27 }
  0x7d   : > { %p1001_p3 = pnand %p999_p6, %p1482_p8  ;;  %p1007_p11 = scmp.lt.s32.totalorder %s1005_s19, %s998_s1 }
  0x7f   : > { %p1002_p5 = pneg %p1001_p3  ;;  %p1008_p1 = por %p1007_p11, %p1006_p7 }
  0x81   : > { %p1009_p0 = pnand %p1008_p1, %p1002_p5 }
  0x83   : > { %1012 = shalt.err (!%p1009_p0)
}
  0x84   : > { %p1484_p13 = scmp.ne.s32.totalorder %s1470_s17, 0  ;;  %p1485_p10 = scmp.ne.s32.totalorder %s1479_s12, 0 }
  0x85   : > { %s1356_s26 = sand.u32 (!%p1485_p10), 1, %s1079_s30   ;;  %p1486_p8 = scmp.ne.s32.totalorder (!%p1485_p10), %s1473_s11, 0 }
  0x86   : > { %830 = dma.hbm_to_vmem [thread:$0]  (!%p1484_p13), %s1288_s6, 128, %s329_s8, %s1204_s24  }
  0x87   : > { %337 = sbr.rel (%p1485_p10) target bundleno = 597 (0x255), region = 52  ;;  %s1359_s13 = sshll.u32 (!%p1485_p10), %s1356_s26, 3 }
  0x88   : > { %s340_s18 = scalar_lea.sflag (!%p1485_p10), [#allocation4], %s1356_s26  ;;  %s343_s28 = scalar_lea.vmem (!%p1485_p10), [#allocation3], %s1359_s13 }
  0x8e   : > { %1058 = dma.done.wait (%p1486_p8), %s340_s18, 128  }
  0x8f   : > { %1060 = vsyncadd (%p1486_p8), %s340_s18, 4294967168  ;;  %s348_s6 = sand.u32 1, %s1235_s25   ;;  %s352_s24 = scalar_lea.vmem [#allocation6], %s1359_s13 }
  0x90   : > { %s349_s17 = scalar_lea.sflag [#allocation7], %s348_s6 }
  0x91   : > { %1062 = dma.done.wait (%p1486_p8), %s349_s17, 256  }
  0x92   : > { %1064 = vsyncadd (%p1486_p8), %s349_s17, 4294967040  ;;  %s361_s12 = scalar_lea.vmem [#allocation8], %s1359_s13  ;;  %p1487_p1 = scmp.eq.s32.totalorder %s1235_s25, 0 }
  0x94   : > { %1066 = dma.done.wait (%p1487_p1), [#allocation10], 512   ;;  %p1488_p2 = pmov %p1487_p1 }
  0x95   : > { %v1095_v0 = vmov 0   ;;  %v875_v1 = vld [vmem:[#allocation9 + $0x4] ss:$8 sps:$4 sm:$0xff]   ;;  %v877_v2 = vld [vmem:[#allocation9] ss:$8 sps:$4 sm:$0xff]   ;;  %v417_v5 = vld [vmem:[%s343_s28] sm:$0xff] }
  0x96   : > { %1068 = vsyncadd (%p1488_p2), [#allocation10], 4294966784  ;;  %475 = vmatprep.mubr.bf16.mxu0 %v1095_v0  ;;  %540 = vmatprep.mubr.bf16.mxu1 %v1095_v0  ;;  %v878_v3 = vld [vmem:[#allocation9 + $0x14] ss:$8 sps:$4 sm:$0xff]   ;;  %v880_v4 = vld [vmem:[#allocation9 + $0x10] ss:$8 sps:$4 sm:$0xff]   ;;  %v418_v7 = vpack.c.bf16 %v417_v5, %v417_v5 }
  0x97   : > { %443 = vmatprep.subr.bf16.mxu0 %v875_v1  ;;  %508 = vmatprep.subr.bf16.mxu1 %v875_v1  ;;  %v503_v6 = vld [vmem:[%s352_s24] sm:$0xff]  ;;  %vm439_vm0 = vcmask 261120   ;;  %v555_v9 = vld [vmem:[%s361_s12] sm:$0xff]  ;;  %s415_s8 = sld [smem:[#allocation2]]  ;;  %s1489_s23 = sld [smem:[#allocation23_spill]] }
  0x98   : > { %444 = vmatpush1.bf16.msra.mxu0 %v877_v2  ;;  %509 = vmatpush1.bf16.msra.mxu1 %v877_v2  ;;  %v504_v8 = vpack.c.bf16 %v503_v6, %v503_v6  ;;  %v556_v10 = vpack.c.bf16 %v555_v9, %v555_v9  ;;  %v796_v11 = vld [vmem:[%s1440_s4] ss:$0 sm:$0xff]  ;;  %s1490_s20 = sld [smem:[#allocation20_spill]]  ;;  %s802_s22 = sshll.u32 %s1235_s25, 7 }
  0x99   : > { %445 = vmatprep.subr.bf16.mxu0 %v878_v3  ;;  %510 = vmatprep.subr.bf16.mxu1 %v878_v3  ;;  %v797_v27 = vld [vmem:[%s1441_s5] ss:$0 sm:$0xff]  ;;  %s407_s14 = scalar_lea.vmem [#allocation11], %s1359_s13  ;;  %s1491_s19 = sld [smem:[#allocation24_spill]] }
  0x9a   : > { %s652_s1 = sshll.u32 %s407_s14, 4  ;;  %s639_s28 = scalar_lea.sflag [#allocation5], %s1356_s26  ;;  %s1394_s1 = int_to_ptr.vmem [resolvable:$true] %s652_s1 }
  0x9b   : > { %s1013_s6 = scalar_lea.vmem %s1394_s1, 128  ;;  %s1096_s25 = smov [#allocation11]  }
  0x9c   : > { %446 = vmatpush1.bf16.msra.mxu0 %v880_v4  ;;  %511 = vmatpush1.bf16.msra.mxu1 %v880_v4  ;;  %p1014_p4 = scmp.ne.s32.totalorder %s1394_s1, %s1013_s6  ;;  %s1017_s13 = sshll.u32 %s1096_s25, 4  ;;  %s1018_s13 = int_to_ptr.vmem [resolvable:$false] %s1017_s13 }
  0x9d   : > { %560 = vmatprep.subr.bf16.mxu0 %v875_v1  ;;  %v501_v35 = vstv %s415_s8  ;;  %v800_v57 = vld [vmem:[%s1489_s23] ss:$0 sm:$0xff]  ;;  %s1019_s17 = scalar_lea.vmem %s1018_s13, 256  ;;  %p1020_p3 = scmp.lt.s32.totalorder %s1394_s1, %s1018_s13 }
  0x9e   : > { %p1492_p9 = scmp.ne.s32.totalorder %s1490_s20, 0  ;;  %p1021_p5 = scmp.lt.s32.totalorder %s1019_s17, %s1013_s6 }
  0x9f   : > { %795 = vmatmul.mubr.msk.bf16.vlgmr.msra.gmra.mrb[0].mxu0 %vm439_vm0, %v418_v7  ;;  %798 = vmatmul.mubr.msk.bf16.vlgmr.msra.gmra.mrb[0].mxu1 %vm439_vm0, %v504_v8  ;;  %s1392_s18 = scalar_lea.hbm %s1491_s19, %s802_s22 }
  0xa0   : > { %561 = vmatpush1.bf16.msra.mxu0 %v877_v2  ;;  %592 = vmatprep.mubr.bf16.mxu0 %v1095_v0  ;;  %p1015_p12 = pnand %p1014_p4, %p1492_p9  ;;  %p1022_p7 = por %p1021_p5, %p1020_p3 }
  0xa1   : > { %562 = vmatprep.subr.bf16.mxu0 %v878_v3 }
  0xa2   : > { %p1016_p6 = pneg %p1015_p12 }
  0xa4   : > { %563 = vmatpush1.bf16.msra.mxu0 %v880_v4  ;;  %p1023_p11 = pnand %p1022_p7, %p1016_p6 }
  0xa7   : > { %799 = vmatmul.mubr.msk.bf16.vlgmr.msra.gmra.mrb[4].mxu0 %vm439_vm0, %v556_v10 }
 0x172   : > { %v477_v12 = vpop.f32.mrb[0].mxu0  ;;  %v542_v13 = vpop.f32.mrb[0].mxu1 }
 0x173   : > { %v490_v14 = vadd.f32 %v796_v11, %v477_v12  ;;  %v479_v15 = vpop.f32.mrb[1].mxu0  ;;  %v549_v16 = vadd.f32 %v796_v11, %v542_v13  ;;  %v544_v17 = vpop.f32.mrb[1].mxu1 }
 0x174   : > { %v481_v18 = vpop.f32.mrb[2].mxu0  ;;  %v546_v19 = vpop.f32.mrb[2].mxu1 }
 0x175   : > { %881 = vtanh.f32 %v490_v14  ;;  %v482_v20 = vpop.f32.mrb[3].mxu0  ;;  %v547_v21 = vpop.f32.mrb[3].mxu1 }
 0x176   : > { %883 = vtanh.f32 %v549_v16 }
 0x17a   : > { %v594_v22 = vpop.f32.mrb[4].mxu0 }
 0x17b   : > { %v601_v23 = vadd.f32 %v796_v11, %v594_v22  ;;  %v596_v24 = vpop.f32.mrb[5].mxu0 }
 0x17c   : > { %v598_v25 = vpop.f32.mrb[6].mxu0 }
 0x17d   : > { %885 = vtanh.f32 %v601_v23  ;;  %v599_v26 = vpop.f32.mrb[7].mxu0 }
 0x17f   : > { %v882_v28 = vpop.eup %881 }
 0x180   : > { %v884_v29 = vpop.eup %883  ;;  %v498_v30 = vmul.f32 %v882_v28, %v797_v27 }
 0x181   : > { %v551_v31 = vmul.f32 %v884_v29, %v797_v27 }
 0x182   : > { %499 = vadd.xlane.f32.xlu0 %v498_v30 }
 0x186   : > { %552 = vadd.xlane.f32.xlu0 %v551_v31 }
 0x187   : > { %v886_v32 = vpop.eup %885 }
 0x188   : > { %v603_v33 = vmul.f32 %v886_v32, %v797_v27 }
 0x18a   : > { %604 = vadd.xlane.f32.xlu1 %v603_v33 }
 0x20f   : > { %v500_v34 = vpop.xlane.xlu0 %499 }
 0x210   : > { %v502_v38 = vadd.f32 %v501_v35, %v500_v34 }
 0x213   : > { %v553_v36 = vpop.xlane.xlu0 %552 }
 0x214   : > { %v554_v37 = vadd.f32 %v553_v36, %v501_v35 }
 0x216   : > { %v607_v40 = vmax.f32 %v502_v38, %v554_v37 }
 0x217   : > { %v605_v39 = vpop.xlane.xlu1 %604 }
 0x218   : > { %v606_v41 = vadd.f32 %v605_v39, %v501_v35 }
 0x21a   : > { %v608_v42 = vmax.f32 %v607_v40, %v606_v41 }
 0x21c   : > { %v609_v43 = vsub.f32 %v502_v38, %v608_v42  ;;  %v612_v44 = vsub.f32 %v554_v37, %v608_v42  ;;  %v615_v45 = vsub.f32 %v606_v41, %v608_v42 }
 0x21e   : > { %v610_v46 = vmul.f32 1.442695, %v609_v43  ;;  %v613_v47 = vmul.f32 1.442695, %v612_v44  ;;  %v616_v48 = vmul.f32 1.442695, %v615_v45 }
 0x220   : > { %887 = vpow2.f32 %v610_v46 }
 0x221   : > { %889 = vpow2.f32 %v613_v47 }
 0x222   : > { %891 = vpow2.f32 %v616_v48 }
 0x22a   : > { %v888_v49 = vpop.eup %887 }
 0x22b   : > { %v890_v50 = vpop.eup %889 }
 0x22c   : > { %v618_v51 = vadd.f32 %v890_v50, %v888_v49  ;;  %v892_v52 = vpop.eup %891 }
 0x22e   : > { %v619_v53 = vadd.f32 %v892_v52, %v618_v51 }
 0x230   : > { %893 = vrcp.f32 %v619_v53 }
 0x23a   : > { %v894_v54 = vpop.eup %893 }
 0x23b   : > { %v621_v55 = vmul.f32 %v894_v54, %v888_v49  ;;  %v630_v56 = vmul.f32 %v894_v54, %v890_v50  ;;  %v633_v58 = vmul.f32 %v894_v54, %v892_v52 }
 0x23d   : > { %v622_v59 = vmul.f32 %v621_v55, %v479_v15  ;;  %v631_v61 = vmul.f32 %v630_v56, %v544_v17  ;;  %v634_v63 = vmul.f32 %v633_v58, %v596_v24 }
 0x23f   : > { %v629_v60 = vadd.f32 %v800_v57, %v622_v59 }
 0x241   : > { %v632_v62 = vadd.f32 %v631_v61, %v629_v60 }
 0x243   : > { %v635_v0 = vadd.f32 %v634_v63, %v632_v62 }
 0x245   : > { %v636_v1 = vmax.f32 %v635_v0, 0.0 }
 0x247   : > { %637 = vst [vmem:[%s407_s14] sm:$0xff] %v636_v1 }
 0x248   : > { %1026 = shalt.err (!%p1023_p11)
}
 0x249   : > { %s1027_s26 = scalar_lea.hbm %s1392_s18, 128  ;;  %s1031_s11 = scalar_lea.hbm %s1491_s19, 256 }
 0x24a   : > { %p1028_p0 = scmp.ne.s32.totalorder %s1392_s18, %s1027_s26  ;;  %p1032_p8 = scmp.lt.u32.totalorder %s1392_s18, %s1491_s19 }
 0x24b   : > { %p1033_p1 = scmp.lt.u32.totalorder %s1031_s11, %s1027_s26  ;;  %p1035_p4 = scmp.lt.u32.totalorder %s1027_s26, %s1392_s18 }
 0x24c   : > { %p1029_p13 = pnand %p1028_p0, %p1492_p9 }
 0x24d   : > { %p1034_p2 = por %p1033_p1, %p1032_p8 }
 0x24e   : > { %p1030_p10 = pneg %p1029_p13 }
 0x24f   : > { %p1036_p12 = por %p1035_p4, %p1034_p2 }
 0x251   : > { %p1037_p6 = pnand %p1036_p12, %p1030_p10 }
 0x253   : > { %1040 = shalt.err (!%p1037_p6)
}
 0x254   : > { %815 = dma.vmem_to_hbm [thread:$0]  (%p1492_p9), %s1394_s1, 128, %s1392_s18, %s639_s28  }
 0x255 PF: > { %s1493_s21 = sld [smem:[#allocation16_spill]]  ;;  %s1494_s8 = sld [smem:[#allocation21_spill]] }
 0x256   : > { %s1495_s10 = sld [smem:[#allocation17_spill]] }
 0x25b   : > { %s664_s16 = sand.u32 1, %s1493_s21   ;;  %p1496_p3 = scmp.ne.s32.totalorder %s1494_s8, 0 }
 0x25c   : > { %p1497_p5 = scmp.ge.s32.totalorder %s1495_s10, 2  ;;  %s665_s23 = scalar_lea.sflag [#allocation5], %s664_s16 }
 0x25e   : > { %p832_p7 = pnand %p1497_p5, %p1496_p3 }
 0x260   : > { %1070 = dma.done.wait (!%p832_p7), %s665_s23, 128  }
 0x261   : > { %1072 = vsyncadd (!%p832_p7), %s665_s23, 4294967168  ;;  %s1498_s10 = sld [smem:[#allocation18_spill]]  ;;  %s1499_s22 = sld [smem:[#allocation19_spill]] }
 0x262   : > { %s1500_s29 = smov %s1079_s30  ;;  %s1501_s30 = smov %s1083_s9 }
 0x267   : > { %p26_p11 = scmp.ge.s32.totalorder %s1498_s10, 4   ;;  %s1502_s9 = smov %s1499_s22 }
 0x269   :  { %28 = sbr.rel (!%p26_p11) target bundleno = 13 (0xd), region = 125 }
 0x270   :  { %670 = vsyncpa [#allocation4], 1 }
 0x271   :  { %672 = vsyncpa [#allocation4 + $0x1], 1 }
 0x272   :  { %673 = vsyncpa [#allocation7], 1 }
 0x273   :  { %675 = vsyncpa [#allocation7 + $0x1], 1 }
 0x274   :  { %676 = vsyncpa [#allocation10], 1 }
 0x275   :  { %677 = vsyncpa [#allocation5], 1 }
 0x276   :  { %679 = vsyncpa [#allocation5 + $0x1], 1 }

</bundles_post_ra>
